<compile_context>
chip_gen: v7x
topology: tpu7x:2x2x1
jax: 0.10.0
libtpu: 0.0.40
codegen_flags: <defaults>
</compile_context>

<pallas_src>
import jax
import jax.numpy as jnp
from jax.experimental import pallas as pl
from jax.experimental.pallas import tpu as pltpu


def _round_up(x, m):
    return (x + m - 1) // m * m


# ---------------------------------------------------------------------------
# Fused kernel: all layers, channel-major (C, N), N on lanes.
# ---------------------------------------------------------------------------
def _make_mlp_kernel(num_layers, negative_slope, eps, true_n):
    inv_n = 1.0 / float(true_n)

    def kernel(*refs):
        x_ref = refs[0]                                 # (C0p, Np) bf16
        mask_ref = refs[1]                              # (Np, 1)  f32 (0 in padded lanes)
        w_refs = refs[2:2 + num_layers]                 # (Cop, Cip) bf16 each
        out_ref = refs[-1]                              # (Clp, Np) f32

        ones_col = mask_ref[...]                        # masked ones column
        h_mm = x_ref[...]                               # bf16 matmul operand
        h = None
        for i in range(num_layers):
            w = w_refs[i][...]
            # Conv1d(k=1) == per-point linear layer -> bf16 MXU matmul, f32 acc.
            # (bias dropped: exactly cancelled by InstanceNorm mean subtraction)
            z = jnp.dot(w, h_mm, preferred_element_type=jnp.float32)   # (C, Np) f32
            # InstanceNorm1d (affine=False, biased var) over the true N lanes.
            # Single-pass stats on the MXU: K=N contraction against the masked
            # ones column excludes padded lanes from the statistics.
            s1 = jnp.dot(z, ones_col, preferred_element_type=jnp.float32)       # (C,1)
            s2 = jnp.dot(z * z, ones_col, preferred_element_type=jnp.float32)   # (C,1)
            mean = s1 * inv_n
            var = s2 * inv_n - mean * mean
            scale = jax.lax.rsqrt(var + eps)            # EUP
            shift = -mean * scale
            h = z * scale + shift                       # normalize (VPU, bcast over lanes)
            # LeakyReLU(0.2): mul + max (valid for 0 <= slope <= 1).
            h = jnp.maximum(h, negative_slope * h)
            if i + 1 < num_layers:
                h_mm = h.astype(jnp.bfloat16)           # bf16 operand for next matmul
        out_ref[...] = h.astype(out_ref.dtype)

    return kernel


# ---------------------------------------------------------------------------
# Wrapper: layout plumbing (channel-major transpose, lane/sublane padding).
# ---------------------------------------------------------------------------
def mlp_forward(x, weights, biases=None, *, negative_slope=0.2, eps=1e-5):
    """x: (N, C0); weights[i]: (C_{i+1}, C_i). Returns (N, C_last).

    `biases` is accepted for API parity with the PyTorch module but unused:
    a per-channel bias before InstanceNorm1d(affine=False) is exactly removed
    by the mean subtraction, so adding it would be dead compute."""
    del biases
    n, c0 = x.shape
    num_layers = len(weights)
    channels = [c0] + [w.shape[0] for w in weights]
    # bf16 matmul operands -> pad channel dims to the bf16 sublane tile (16).
    cpad = [_round_up(c, 16) for c in channels]
    npad = _round_up(n, 128)        # lane-dense loads/stores for arbitrary N

    # Channel-major bf16 input slab, zero-padded channels and lanes.
    x_cn = jnp.pad(x.T.astype(jnp.bfloat16),
                   ((0, cpad[0] - c0), (0, npad - n)))
    # Masked ones column for the stats matmuls (0 in padded lanes).
    mask_col = (jnp.arange(npad, dtype=jnp.int32) < n
                ).astype(jnp.float32).reshape(npad, 1)
    # Zero-padded bf16 weights (padded rows/cols keep padded channels at 0).
    w_p = [jnp.pad(w.astype(jnp.bfloat16),
                   ((0, cpad[i + 1] - w.shape[0]), (0, cpad[i] - w.shape[1])))
           for i, w in enumerate(weights)]

    kernel = _make_mlp_kernel(num_layers, negative_slope, eps, n)
    vmem_spec = pl.BlockSpec(memory_space=pltpu.MemorySpace.VMEM)

    # Scoped-VMEM budget from the actual footprint: input (bf16) + output
    # (f32) + a few live (Cmax, Np) f32/bf16 temps; clamp to [16 MiB, 64 MiB]
    # (v5e's default scoped limit is only 16 MiB; v7x physical VMEM is 64 MiB).
    cmax = max(cpad)
    est = npad * (cpad[0] * 2 + cpad[-1] * 4 + 6 * cmax * 4) + (2 << 20)
    vmem_limit = int(min(max(est, 16 << 20), 64 << 20))

    out_p = pl.pallas_call(
        kernel,
        out_shape=jax.ShapeDtypeStruct((cpad[-1], npad), x.dtype),
        in_specs=[vmem_spec] * (2 + num_layers),
        out_specs=vmem_spec,
        compiler_params=pltpu.CompilerParams(vmem_limit_bytes=vmem_limit),
    )(x_cn, mask_col, *w_p)

    # Back to the PyTorch (N, C_last) convention; drop padded channels/lanes.
    return out_p[:channels[-1], :n].T


# ---------------------------------------------------------------------------
# Pure-JAX reference mirroring the PyTorch forward (with bias), for checking.
# ---------------------------------------------------------------------------
def mlp_reference(x, weights, biases, negative_slope=0.2, eps=1e-5):
    h = x.T                                                     # (C0, N)
    for w, b in zip(weights, biases):
        h = w @ h + b[:, None]
        mean = jnp.mean(h, axis=1, keepdims=True)
        var = jnp.mean((h - mean) ** 2, axis=1, keepdims=True)
        h = (h - mean) / jnp.sqrt(var + eps)
        h = jnp.where(h >= 0.0, h, negative_slope * h)
    return h.T


if __name__ == "__main__":
    key = jax.random.PRNGKey(0)
    channels = (4, 32, 64)      # MLP([4, 32, 64])

    keys = jax.random.split(key, 2 + 2 * (len(channels) - 1))
    weights, biases = [], []
    for i in range(len(channels) - 1):
        fan_in = float(channels[i])
        w = jax.random.normal(keys[2 + 2 * i],
                              (channels[i + 1], channels[i]),
                              dtype=jnp.float32) / jnp.sqrt(fan_in)
        b = jax.random.normal(keys[3 + 2 * i], (channels[i + 1],),
                              dtype=jnp.float32) * 0.1
        weights.append(w)
        biases.append(b)

    # bf16 MXU operands => loosen the max-abs tolerance vs the f32 reference
    # (normalization each layer keeps the error small and bounded).
    TOL = 0.1
    for N in (256, 200):        # lane-aligned and non-aligned point counts
        xk = keys[0] if N == 256 else keys[1]
        x = jax.random.normal(xk, (N, channels[0]), dtype=jnp.float32)

        out = mlp_forward(x, weights, biases)
        out = jax.block_until_ready(out)

        ref = mlp_reference(x, weights, biases)
        assert out.shape == ref.shape == (N, channels[-1]), (out.shape, ref.shape)
        assert out.dtype == ref.dtype, (out.dtype, ref.dtype)
        err = float(jnp.max(jnp.abs(out - ref)))
        assert err < TOL, (N, err)

    print("KERNEL_OK")
</pallas_src>

<mosaic_0001>
module attributes {stable_mosaic.version = 11 : i64} {
  func.func @kernel(%arg0: memref<16x256xbf16, #tpu.memory_space<vmem>>, %arg1: memref<256x1xf32, #tpu.memory_space<vmem>>, %arg2: memref<32x16xbf16, #tpu.memory_space<vmem>>, %arg3: memref<64x32xbf16, #tpu.memory_space<vmem>>, %arg4: memref<64x256xf32, #tpu.memory_space<vmem>>) attributes {dimension_semantics = [], scalar_prefetch = 0 : i64, scratch_operands = 0 : i64, tpu.core_type = #tpu.core_type<tc>} {
    %c0 = arith.constant 0 : index
    %c0_0 = arith.constant 0 : index
    %0 = vector.load %arg1[%c0, %c0_0] : memref<256x1xf32, #tpu.memory_space<vmem>>, vector<256x1xf32>
    %c0_1 = arith.constant 0 : index
    %c0_2 = arith.constant 0 : index
    %1 = vector.load %arg0[%c0_1, %c0_2] : memref<16x256xbf16, #tpu.memory_space<vmem>>, vector<16x256xbf16>
    %c0_3 = arith.constant 0 : index
    %c0_4 = arith.constant 0 : index
    %2 = vector.load %arg2[%c0_3, %c0_4] : memref<32x16xbf16, #tpu.memory_space<vmem>>, vector<32x16xbf16>
    %cst = arith.constant dense<0.000000e+00> : vector<32x256xf32>
    %3 = tpu.matmul %2, %1, %cst {dimension_numbers = #tpu.dot_dimension_numbers<[1], [0], [0], [1], [0, 0, 1, 1], [], []>} : vector<32x16xbf16>, vector<16x256xbf16>, vector<32x256xf32> -> vector<32x256xf32>
    %cst_5 = arith.constant dense<0.000000e+00> : vector<32x1xf32>
    %4 = tpu.matmul %3, %0, %cst_5 {dimension_numbers = #tpu.dot_dimension_numbers<[1], [0], [0], [1], [0, 0, 1, 1], [], []>} : vector<32x256xf32>, vector<256x1xf32>, vector<32x1xf32> -> vector<32x1xf32>
    %5 = arith.mulf %3, %3 : vector<32x256xf32>
    %cst_6 = arith.constant dense<0.000000e+00> : vector<32x1xf32>
    %6 = tpu.matmul %5, %0, %cst_6 {dimension_numbers = #tpu.dot_dimension_numbers<[1], [0], [0], [1], [0, 0, 1, 1], [], []>} : vector<32x256xf32>, vector<256x1xf32>, vector<32x1xf32> -> vector<32x1xf32>
    %cst_7 = arith.constant 3.906250e-03 : f32
    %7 = vector.broadcast %cst_7 : f32 to vector<32x1xf32>
    %8 = arith.mulf %4, %7 : vector<32x1xf32>
    %cst_8 = arith.constant 3.906250e-03 : f32
    %9 = vector.broadcast %cst_8 : f32 to vector<32x1xf32>
    %10 = arith.mulf %6, %9 : vector<32x1xf32>
    %11 = arith.mulf %8, %8 : vector<32x1xf32>
    %12 = arith.subf %10, %11 : vector<32x1xf32>
    %cst_9 = arith.constant 9.99999974E-6 : f32
    %13 = vector.broadcast %cst_9 : f32 to vector<32x1xf32>
    %14 = arith.addf %12, %13 : vector<32x1xf32>
    %15 = math.rsqrt %14 : vector<32x1xf32>
    %cst_10 = arith.constant 0.000000e+00 : f32
    %16 = vector.broadcast %cst_10 : f32 to vector<32x1xf32>
    %17 = arith.subf %16, %8 : vector<32x1xf32>
    %18 = arith.mulf %17, %15 : vector<32x1xf32>
    %19 = vector.broadcast %15 : vector<32x1xf32> to vector<32x256xf32>
    %20 = arith.mulf %3, %19 : vector<32x256xf32>
    %21 = vector.broadcast %18 : vector<32x1xf32> to vector<32x256xf32>
    %22 = arith.addf %20, %21 : vector<32x256xf32>
    %cst_11 = arith.constant 2.000000e-01 : f32
    %23 = vector.broadcast %cst_11 : f32 to vector<32x256xf32>
    %24 = arith.mulf %23, %22 : vector<32x256xf32>
    %25 = arith.maximumf %22, %24 : vector<32x256xf32>
    %26 = arith.truncf %25 : vector<32x256xf32> to vector<32x256xbf16>
    %c0_12 = arith.constant 0 : index
    %c0_13 = arith.constant 0 : index
    %27 = vector.load %arg3[%c0_12, %c0_13] : memref<64x32xbf16, #tpu.memory_space<vmem>>, vector<64x32xbf16>
    %cst_14 = arith.constant dense<0.000000e+00> : vector<64x256xf32>
    %28 = tpu.matmul %27, %26, %cst_14 {dimension_numbers = #tpu.dot_dimension_numbers<[1], [0], [0], [1], [0, 0, 1, 1], [], []>} : vector<64x32xbf16>, vector<32x256xbf16>, vector<64x256xf32> -> vector<64x256xf32>
    %cst_15 = arith.constant dense<0.000000e+00> : vector<64x1xf32>
    %29 = tpu.matmul %28, %0, %cst_15 {dimension_numbers = #tpu.dot_dimension_numbers<[1], [0], [0], [1], [0, 0, 1, 1], [], []>} : vector<64x256xf32>, vector<256x1xf32>, vector<64x1xf32> -> vector<64x1xf32>
    %30 = arith.mulf %28, %28 : vector<64x256xf32>
    %cst_16 = arith.constant dense<0.000000e+00> : vector<64x1xf32>
    %31 = tpu.matmul %30, %0, %cst_16 {dimension_numbers = #tpu.dot_dimension_numbers<[1], [0], [0], [1], [0, 0, 1, 1], [], []>} : vector<64x256xf32>, vector<256x1xf32>, vector<64x1xf32> -> vector<64x1xf32>
    %cst_17 = arith.constant 3.906250e-03 : f32
    %32 = vector.broadcast %cst_17 : f32 to vector<64x1xf32>
    %33 = arith.mulf %29, %32 : vector<64x1xf32>
    %cst_18 = arith.constant 3.906250e-03 : f32
    %34 = vector.broadcast %cst_18 : f32 to vector<64x1xf32>
    %35 = arith.mulf %31, %34 : vector<64x1xf32>
    %36 = arith.mulf %33, %33 : vector<64x1xf32>
    %37 = arith.subf %35, %36 : vector<64x1xf32>
    %cst_19 = arith.constant 9.99999974E-6 : f32
    %38 = vector.broadcast %cst_19 : f32 to vector<64x1xf32>
    %39 = arith.addf %37, %38 : vector<64x1xf32>
    %40 = math.rsqrt %39 : vector<64x1xf32>
    %cst_20 = arith.constant 0.000000e+00 : f32
    %41 = vector.broadcast %cst_20 : f32 to vector<64x1xf32>
    %42 = arith.subf %41, %33 : vector<64x1xf32>
    %43 = arith.mulf %42, %40 : vector<64x1xf32>
    %44 = vector.broadcast %40 : vector<64x1xf32> to vector<64x256xf32>
    %45 = arith.mulf %28, %44 : vector<64x256xf32>
    %46 = vector.broadcast %43 : vector<64x1xf32> to vector<64x256xf32>
    %47 = arith.addf %45, %46 : vector<64x256xf32>
    %cst_21 = arith.constant 2.000000e-01 : f32
    %48 = vector.broadcast %cst_21 : f32 to vector<64x256xf32>
    %49 = arith.mulf %48, %47 : vector<64x256xf32>
    %50 = arith.maximumf %47, %49 : vector<64x256xf32>
    %c0_22 = arith.constant 0 : index
    %c0_23 = arith.constant 0 : index
    %51 = vector.load %arg4[%c0_22, %c0_23] : memref<64x256xf32, #tpu.memory_space<vmem>>, vector<64x256xf32>
    tpu.vector_store %arg4[%c0_22, %c0_23], %50 {strides = array<i32>} : memref<64x256xf32, #tpu.memory_space<vmem>>, vector<64x256xf32>,
    return
  }
}

</mosaic_0001>

<bundles_post_ra>
// kernel: tpu_custom_call.1
= control target key start
LH: loop header
LB: loop body
LE: loop exit
PB: predicated region body
PF: predicated region fallthrough
CT: control target
= control target key end

     0   :  { %v1424_v2 = vmov 0   ;;  %vm77_vm0 = vcmask 130048   ;;  %s1878_s0 = inlined_call_operand.vmem [shape: bf16[16,256], index: 0, kind: input, shape index: {}]   ;;  %s1879_s1 = inlined_call_operand.vmem [shape: f32[256,1], index: 1, kind: input, shape index: {}]   ;;  %s1880_s2 = inlined_call_operand.vmem [shape: bf16[32,16], index: 2, kind: input, shape index: {}]   ;;  %s1881_s3 = inlined_call_operand.vmem [shape: bf16[64,32], index: 3, kind: input, shape index: {}]   ;;  %s1882_s4 = inlined_call_operand.hbm [shape: f32[64,256], index: 4, kind: output, shape index: {}]  }
   0x1   :  { %v1367_v0 = vld [vmem:[%s1878_s0 + $0x4] ss:$8 sps:$4 sm:$0xff]   ;;  %v1369_v1 = vld [vmem:[%s1878_s0] ss:$8 sps:$4 sm:$0xff]   ;;  %116 = vmatprep.mubr.bf16.mxu0 %v1424_v2  ;;  %1365 = vset.pattern.permute.xlu0 %v1424_v2  ;;  %v37_v9 = vld [vmem:[%s1879_s1 + $0x90] sm:$0xff] }
   0x2   :  { %84 = vmatprep.subr.bf16.mxu0 %v1367_v0  ;;  %v1370_v3 = vld [vmem:[%s1880_s2] sm:$0xff]   ;;  %1366 = vset.pattern.permute.xlu1 %v1424_v2  ;;  %v36_v5 = vld [vmem:[%s1879_s1 + $0x88] sm:$0xff]  ;;  %v38_v11 = vld [vmem:[%s1879_s1 + $0x98] sm:$0xff] }
   0x3   :  { %85 = vmatpush1.bf16.msra.mxu0 %v1369_v1  ;;  %v35_v4 = vld [vmem:[%s1879_s1 + $0x80] sm:$0xff]  ;;  %v20_v8 = vld [vmem:[%s1879_s1 + $0x8] sm:$0xff]  ;;  %v21_v12 = vld [vmem:[%s1879_s1 + $0x10] sm:$0xff]  ;;  %v1495_v14 = vpack.c.bf16 %v38_v11, %v37_v9 }
   0x4   :  { %v1471_v6 = vpack.c.bf16 %v36_v5, %v35_v4  ;;  %v19_v7 = vld [vmem:[%s1879_s1] sm:$0xff]  ;;  %v22_v13 = vld [vmem:[%s1879_s1 + $0x18] sm:$0xff]  ;;  %v40_v16 = vld [vmem:[%s1879_s1 + $0xa8] sm:$0xff] }
   0x5   :  { %v1482_v10 = vpack.c.bf16 %v20_v8, %v19_v7  ;;  %v39_v15 = vld [vmem:[%s1879_s1 + $0xa0] sm:$0xff]  ;;  %v1505_v17 = vpack.c.bf16 %v22_v13, %v21_v12  ;;  %v24_v20 = vld [vmem:[%s1879_s1 + $0x28] sm:$0xff]  ;;  %v41_v21 = vld [vmem:[%s1879_s1 + $0xb0] sm:$0xff] }
   0x6   :  { %1007 = vmatmul.mubr.msk.bf16.vlgmr.msra.gmra.mrb[0].mxu0 %vm77_vm0, %v1370_v3  ;;  %1218 = vmatprep.subr.bf16.mxu1 %v1471_v6  ;;  %v1509_v18 = vpack.c.bf16 %v40_v16, %v39_v15  ;;  %v23_v19 = vld [vmem:[%s1879_s1 + $0x20] sm:$0xff]  ;;  %v42_v22 = vld [vmem:[%s1879_s1 + $0xb8] sm:$0xff]  ;;  %v1371_v23 = vld [vmem:[%s1880_s2 + $0x8] sm:$0xff]  }
   0x7   :  { %126 = vmatprep.mubr.bf16.mxu0 %v1424_v2  ;;  %1220 = vmatpush3.bf16.msra.mxu1 %v1482_v10  ;;  %v1529_v24 = vpack.c.bf16 %v24_v20, %v23_v19  ;;  %v1532_v25 = vpack.c.bf16 %v42_v22, %v41_v21  ;;  %v25_v26 = vld [vmem:[%s1879_s1 + $0x30] sm:$0xff]  ;;  %v26_v27 = vld [vmem:[%s1879_s1 + $0x38] sm:$0xff]  ;;  %v43_v28 = vld [vmem:[%s1879_s1 + $0xc0] sm:$0xff] }
   0x8   :  { %1250 = vmatprep.subr.bf16.mxu0 %v1471_v6  ;;  %1222 = vmatprep.subr.bf16.mxu1 %v1495_v14  ;;  %v44_v29 = vld [vmem:[%s1879_s1 + $0xc8] sm:$0xff]  ;;  %v1550_v30 = vpack.c.bf16 %v26_v27, %v25_v26  ;;  %v27_v32 = vld [vmem:[%s1879_s1 + $0x40] sm:$0xff] }
   0x9   :  { %1252 = vmatpush3.bf16.msra.mxu0 %v1482_v10  ;;  %v1553_v31 = vpack.c.bf16 %v44_v29, %v43_v28  ;;  %v28_v33 = vld [vmem:[%s1879_s1 + $0x48] sm:$0xff] }
   0xa   :  { %1254 = vmatprep.subr.bf16.mxu0 %v1495_v14 }
   0xb   :  { %1224 = vmatpush3.bf16.msra.mxu1 %v1505_v17 }
   0xc   :  { %1226 = vmatprep.subr.bf16.mxu1 %v1509_v18 }
   0xd   :  { %1256 = vmatpush3.bf16.msra.mxu0 %v1505_v17 }
   0xe   :  { %1008 = vmatmul.mubr.msk.bf16.gmra.mrb[4].mxu0 %vm77_vm0, %v1371_v23  ;;  %1258 = vmatprep.subr.bf16.mxu0 %v1509_v18 }
   0xf   :  { %1228 = vmatpush3.bf16.msra.mxu1 %v1529_v24 }
  0x10   :  { %1230 = vmatprep.subr.bf16.mxu1 %v1532_v25 }
  0x11   :  { %9 = vsyncpa [#allocation3], 0  ;;  %1260 = vmatpush3.bf16.msra.mxu0 %v1529_v24  ;;  %v45_v34 = vld [vmem:[%s1879_s1 + $0xd0] sm:$0xff]  ;;  %v46_v35 = vld [vmem:[%s1879_s1 + $0xd8] sm:$0xff]  ;;  %v1570_v36 = vpack.c.bf16 %v28_v33, %v27_v32  ;;  %vm451_vm1 = vcmask 261120  }
  0x12   :  { %1262 = vmatprep.subr.bf16.mxu0 %v1532_v25  ;;  %v1573_v37 = vpack.c.bf16 %v46_v35, %v45_v34  ;;  %v29_v38 = vld [vmem:[%s1879_s1 + $0x50] sm:$0xff]  ;;  %v30_v39 = vld [vmem:[%s1879_s1 + $0x58] sm:$0xff]  ;;  %v47_v40 = vld [vmem:[%s1879_s1 + $0xe0] sm:$0xff] }
  0x13   :  { %1232 = vmatpush3.bf16.msra.mxu1 %v1550_v30  ;;  %v48_v41 = vld [vmem:[%s1879_s1 + $0xe8] sm:$0xff]  ;;  %v1590_v42 = vpack.c.bf16 %v30_v39, %v29_v38  ;;  %v31_v44 = vld [vmem:[%s1879_s1 + $0x60] sm:$0xff]  ;;  %v49_v46 = vld [vmem:[%s1879_s1 + $0xf0] sm:$0xff] }
  0x14   :  { %1234 = vmatprep.subr.bf16.mxu1 %v1553_v31  ;;  %v1593_v43 = vpack.c.bf16 %v48_v41, %v47_v40  ;;  %v32_v45 = vld [vmem:[%s1879_s1 + $0x68] sm:$0xff]  ;;  %v50_v47 = vld [vmem:[%s1879_s1 + $0xf8] sm:$0xff]  ;;  %v33_v50 = vld [vmem:[%s1879_s1 + $0x70] sm:$0xff] }
  0x15   :  { %1264 = vmatpush3.bf16.msra.mxu0 %v1550_v30  ;;  %v1610_v48 = vpack.c.bf16 %v32_v45, %v31_v44  ;;  %v1613_v49 = vpack.c.bf16 %v50_v47, %v49_v46  ;;  %v34_v51 = vld [vmem:[%s1879_s1 + $0x78] sm:$0xff] }
  0x16   :  { %1266 = vmatprep.subr.bf16.mxu0 %v1553_v31  ;;  %v1627_v52 = vpack.c.bf16 %v34_v51, %v33_v50 }
  0x17   :  { %1236 = vmatpush3.bf16.msra.mxu1 %v1570_v36 }
  0x18   :  { %1238 = vmatprep.subr.bf16.mxu1 %v1573_v37 }
  0x19   :  { %1268 = vmatpush3.bf16.msra.mxu0 %v1570_v36 }
  0x1a   :  { %1270 = vmatprep.subr.bf16.mxu0 %v1573_v37 }
  0x1b   :  { %1240 = vmatpush3.bf16.msra.mxu1 %v1590_v42 }
  0x1c   :  { %1242 = vmatprep.subr.bf16.mxu1 %v1593_v43 }
  0x1d   :  { %1272 = vmatpush3.bf16.msra.mxu0 %v1590_v42 }
  0x1e   :  { %1274 = vmatprep.subr.bf16.mxu0 %v1593_v43 }
  0x1f   :  { %1244 = vmatpush3.bf16.msra.mxu1 %v1610_v48 }
  0x20   :  { %1246 = vmatprep.subr.bf16.mxu1 %v1613_v49 }
  0x21   :  { %1276 = vmatpush3.bf16.msra.mxu0 %v1610_v48 }
  0x22   :  { %1278 = vmatprep.subr.bf16.mxu0 %v1613_v49 }
  0x23   :  { %1248 = vmatpush3.bf16.msra.mxu1 %v1627_v52 }
  0x25   :  { %1280 = vmatpush3.bf16.msra.mxu0 %v1627_v52 }
  0x26   :  { %1282 = vmatprep.subr.bf16.mxu0 %v1471_v6 }
  0xd9   :  { %v1632_v53 = vpop.f32.mrb[0].mxu0 }
  0xda   :  { %v1634_v54 = vpop.f32.mrb[1].mxu0  ;;  %v222_v57 = vmul.f32 %v1632_v53, %v1632_v53 }
  0xdb   :  { %v223_v55 = vmul.f32 %v1634_v54, %v1634_v54  ;;  %v1638_v56 = vpop.f32.mrb[2].mxu0  ;;  %201 = vmatprep.mubr.f32.mxu1 %v1634_v54 }
  0xdc   :  { %v1643_v58 = vpop.f32.mrb[3].mxu0  ;;  %202 = vmatmul.mubr.f32.vlgmr.msra.gmra.mrb[0].mxu1 %v1632_v53  ;;  %v224_v60 = vmul.f32 %v1638_v56, %v1638_v56 }
  0xdd   :  { %v225_v59 = vmul.f32 %v1643_v58, %v1643_v58  ;;  %206 = vmatprep.mubr.f32.mxu1 %v1643_v58  ;;  %294 = vmatprep.mubr.f32.mxu0 %v223_v55 }
  0xde   :  { %295 = vmatmul.mubr.f32.vlgmr.msra.gmra.mrb[8].mxu0 %v222_v57 }
  0xdf   :  { %299 = vmatprep.mubr.f32.mxu0 %v225_v59  ;;  %1284 = vmatpush3.bf16.msra.mxu0 %v1482_v10 }
  0xe0   :  { %207 = vmatmul.mubr.f32.gmra.mrb[2].mxu1 %v1638_v56  ;;  %1286 = vmatprep.subr.bf16.mxu0 %v1495_v14 }
  0xe1   :  { %v1654_v61 = vpop.f32.mrb[4].mxu0 }
  0xe2   :  { %v1656_v62 = vpop.f32.mrb[5].mxu0  ;;  %300 = vmatmul.mubr.f32.gmra.mrb[10].mxu0 %v224_v60  ;;  %v226_v1 = vmul.f32 %v1654_v61, %v1654_v61 }
  0xe3   :  { %v227_v63 = vmul.f32 %v1656_v62, %v1656_v62  ;;  %v1660_v0 = vpop.f32.mrb[6].mxu0  ;;  %211 = vmatprep.mubr.f32.mxu1 %v1656_v62  ;;  %1288 = vmatpush3.bf16.msra.mxu0 %v1505_v17 }
  0xe4   :  { %v1666_v3 = vpop.f32.mrb[7].mxu0  ;;  %212 = vmatmul.mubr.f32.gmra.mrb[4].mxu1 %v1654_v61  ;;  %1290 = vmatprep.subr.bf16.mxu0 %v1509_v18  ;;  %v228_v5 = vmul.f32 %v1660_v0, %v1660_v0 }
  0xe5   :  { %v229_v4 = vmul.f32 %v1666_v3, %v1666_v3  ;;  %216 = vmatprep.mubr.f32.mxu1 %v1666_v3  ;;  %304 = vmatprep.mubr.f32.mxu0 %v227_v63 }
  0xe6   :  { %305 = vmatmul.mubr.f32.gmra.mrb[12].mxu0 %v226_v1 }
  0xe7   :  { %309 = vmatprep.mubr.f32.mxu0 %v229_v4  ;;  %1292 = vmatpush3.bf16.msra.mxu0 %v1529_v24 }
  0xe8   :  { %217 = vmatmul.mubr.f32.gmra.mrb[6].mxu1 %v1660_v0  ;;  %1294 = vmatprep.subr.bf16.mxu0 %v1532_v25 }
  0xe9   :  { %496 = vmatprep.mubr.bf16.mxu1 %v1424_v2 }
  0xea   :  { %310 = vmatmul.mubr.f32.gmra.mrb[14].mxu0 %v228_v5 }
  0xeb   :  { %1296 = vmatpush3.bf16.msra.mxu0 %v1550_v30 }
  0xec   :  { %1298 = vmatprep.subr.bf16.mxu0 %v1553_v31 }
  0xef   :  { %1300 = vmatpush3.bf16.msra.mxu0 %v1570_v36 }
  0xf0   :  { %1302 = vmatprep.subr.bf16.mxu0 %v1573_v37 }
  0xf3   :  { %1304 = vmatpush3.bf16.msra.mxu0 %v1590_v42 }
  0xf4   :  { %1306 = vmatprep.subr.bf16.mxu0 %v1593_v43 }
  0xf7   :  { %1308 = vmatpush3.bf16.msra.mxu0 %v1610_v48 }
  0xf8   :  { %1310 = vmatprep.subr.bf16.mxu0 %v1613_v49 }
  0xfb   :  { %1312 = vmatpush3.bf16.msra.mxu0 %v1627_v52 }
  0xfc   :  { %1314 = vmatprep.subr.bf16.mxu0 %v1471_v6 }
 0x1af   :  { %v1049_v7 = vpop.f32.mrb[0].mxu1 }
 0x1b0   :  { %v1050_v8 = vpop.f32.mrb[1].mxu1 }
 0x1b1   :  { %v1051_v9 = vadd.f32 %v1050_v8, %v1049_v7  ;;  %v1093_v11 = vpop.f32.mrb[8].mxu0 }
 0x1b2   :  { %v1094_v12 = vpop.f32.mrb[9].mxu0 }
 0x1b3   :  { %v315_v13 = vmul.f32 0.00390625, %v1051_v9  ;;  %v1095_v15 = vadd.f32 %v1094_v12, %v1093_v11  ;;  %v1052_v16 = vpop.f32.mrb[2].mxu1 }
 0x1b4   :  { %v1053_v19 = vpop.f32.mrb[3].mxu1 }
 0x1b5   :  { %v323_v20 = vmul.f32 %v315_v13, %v315_v13  ;;  %v319_v21 = vmul.f32 0.00390625, %v1095_v15  ;;  %v1054_v22 = vadd.f32 %v1053_v19, %v1052_v16  ;;  %v1096_v23 = vpop.f32.mrb[10].mxu0  ;;  %v339_v12 = vsub.f32 0.0, %v315_v13 }
 0x1b6   :  { %v1097_v26 = vpop.f32.mrb[11].mxu0 }
 0x1b7   :  { %v327_v27 = vsub.f32 %v319_v21, %v323_v20  ;;  %v316_v28 = vmul.f32 0.00390625, %v1054_v22  ;;  %v1098_v29 = vadd.f32 %v1097_v26, %v1096_v23  ;;  %v1055_v32 = vpop.f32.mrb[4].mxu1 }
 0x1b8   :  { %v1056_v33 = vpop.f32.mrb[5].mxu1 }
 0x1b9   :  { %v331_v34 = vadd.f32 1e-05, %v327_v27  ;;  %v324_v35 = vmul.f32 %v316_v28, %v316_v28  ;;  %v320_v38 = vmul.f32 0.00390625, %v1098_v29  ;;  %v1099_v39 = vpop.f32.mrb[12].mxu0  ;;  %v1057_v40 = vadd.f32 %v1056_v33, %v1055_v32 }
 0x1ba   :  { %v1100_v41 = vpop.f32.mrb[13].mxu0  ;;  %v340_v20 = vsub.f32 0.0, %v316_v28 }
 0x1bb   :  { %1376 = vrsqrt.f32 %v331_v34  ;;  %v328_v44 = vsub.f32 %v320_v38, %v324_v35  ;;  %v1101_v45 = vadd.f32 %v1100_v41, %v1099_v39  ;;  %v1058_v46 = vpop.f32.mrb[6].mxu1  ;;  %v317_v47 = vmul.f32 0.00390625, %v1057_v40 }
 0x1bc   :  { %v1059_v50 = vpop.f32.mrb[7].mxu1 }
 0x1bd   :  { %v332_v51 = vadd.f32 1e-05, %v328_v44  ;;  %v321_v55 = vmul.f32 0.00390625, %v1101_v45  ;;  %v1060_v57 = vadd.f32 %v1059_v50, %v1058_v46  ;;  %v1102_v59 = vpop.f32.mrb[14].mxu0  ;;  %v325_v60 = vmul.f32 %v317_v47, %v317_v47 }
 0x1be   :  { %v1103_v63 = vpop.f32.mrb[15].mxu0  ;;  %v341_v23 = vsub.f32 0.0, %v317_v47 }
 0x1bf   :  { %1378 = vrsqrt.f32 %v332_v51  ;;  %v318_v1 = vmul.f32 0.00390625, %v1060_v57  ;;  %v1104_v4 = vadd.f32 %v1103_v63, %v1102_v59  ;;  %v329_v5 = vsub.f32 %v321_v55, %v325_v60 }
 0x1c1   :  { %v326_v7 = vmul.f32 %v318_v1, %v318_v1  ;;  %v322_v8 = vmul.f32 0.00390625, %v1104_v4  ;;  %v333_v9 = vadd.f32 1e-05, %v329_v5  ;;  %v342_v29 = vsub.f32 0.0, %v318_v1 }
 0x1c3   :  { %v330_v11 = vsub.f32 %v322_v8, %v326_v7  ;;  %1380 = vrsqrt.f32 %v333_v9 }
 0x1c5   :  { %v1377_v15 = vpop.eup %1376  ;;  %v334_v16 = vadd.f32 1e-05, %v330_v11 }
 0x1c6   :  { %349 = vperm.xlu0 %1365, %v1377_v15   ;;  %v343_v19 = vmul.f32 %v1377_v15, %v339_v12 }
 0x1c7   :  { %1382 = vrsqrt.f32 %v334_v16 }
 0x1c8   :  { %377 = vperm.xlu1 %1366, %v343_v19  }
 0x1c9   :  { %v1379_v21 = vpop.eup %1378 }
 0x1ca   :  { %354 = vperm.xlu0 %1365, %v1379_v21   ;;  %v344_v22 = vmul.f32 %v1379_v21, %v340_v20 }
 0x1cc   :  { %382 = vperm.xlu1 %1366, %v344_v22  }
 0x1cd   :  { %v1381_v26 = vpop.eup %1380 }
 0x1ce   :  { %359 = vperm.xlu0 %1365, %v1381_v26   ;;  %v345_v27 = vmul.f32 %v1381_v26, %v341_v23 }
 0x1d1   :  { %v1383_v32 = vpop.eup %1382 }
 0x1d2   :  { %364 = vperm.xlu1 %1366, %v1383_v32   ;;  %v346_v13 = vmul.f32 %v1383_v32, %v342_v29  ;;  %387 = vperm.xlu0 %1365, %v345_v27  }
 0x1d6   :  { %392 = vperm.xlu1 %1366, %v346_v13   ;;  %v1375_v13 = vld [vmem:[%s1881_s3 + $0x18] sm:$0xff]  }
 0x245   :  { %v350_v33 = vpop.permute.xlu0 %349 }
 0x246   :  { %v367_v34 = vmul.f32 %v350_v33, %v1632_v53  ;;  %v368_v28 = vmul.f32 %v350_v33, %v1634_v54 }
 0x247   :  { %v378_v35 = vpop.permute.xlu1 %377 }
 0x248   :  { %v395_v38 = vadd.f32 %v378_v35, %v367_v34  ;;  %v396_v39 = vadd.f32 %v378_v35, %v368_v28 }
 0x249   :  { %v355_v40 = vpop.permute.xlu0 %354 }
 0x24a   :  { %v369_v41 = vmul.f32 %v355_v40, %v1638_v56  ;;  %v370_v44 = vmul.f32 %v355_v40, %v1643_v58  ;;  %v403_v46 = vmul.f32 0.2, %v395_v38  ;;  %v404_v47 = vmul.f32 0.2, %v396_v39 }
 0x24b   :  { %v383_v45 = vpop.permute.xlu1 %382 }
 0x24c   :  { %v397_v50 = vadd.f32 %v383_v45, %v369_v41  ;;  %v398_v51 = vadd.f32 %v383_v45, %v370_v44  ;;  %v411_v60 = vmax.f32 %v395_v38, %v403_v46  ;;  %v412_v53 = vmax.f32 %v396_v39, %v404_v47 }
 0x24d   :  { %v360_v59 = vpop.permute.xlu0 %359 }
 0x24e   :  { %v405_v55 = vmul.f32 0.2, %v397_v50  ;;  %v406_v57 = vmul.f32 0.2, %v398_v51  ;;  %v371_v1 = vmul.f32 %v360_v59, %v1654_v61  ;;  %v372_v4 = vmul.f32 %v360_v59, %v1656_v62 }
 0x250   :  { %v413_v63 = vmax.f32 %v397_v50, %v405_v55  ;;  %v414_v54 = vmax.f32 %v398_v51, %v406_v57 }
 0x251   :  { %v365_v5 = vpop.permute.xlu1 %364  ;;  %v388_v7 = vpop.permute.xlu0 %387 }
 0x252   :  { %v419_v56 = vpack.c.bf16 %v413_v63, %v411_v60  ;;  %v420_v58 = vpack.c.bf16 %v414_v54, %v412_v53  ;;  %v399_v8 = vadd.f32 %v388_v7, %v371_v1  ;;  %v400_v9 = vadd.f32 %v388_v7, %v372_v4 }
 0x253   :  { %v373_v11 = vmul.f32 %v365_v5, %v1660_v0  ;;  %v374_v12 = vmul.f32 %v365_v5, %v1666_v3  ;;  %v1372_v0 = vld [vmem:[%s1881_s3] sm:$0xff]   ;;  %v1373_v3 = vld [vmem:[%s1881_s3 + $0x8] sm:$0xff]  }
 0x254   :  { %464 = vmatprep.subr.bf16.mxu1 %v420_v58  ;;  %v407_v16 = vmul.f32 0.2, %v399_v8  ;;  %v408_v19 = vmul.f32 0.2, %v400_v9 }
 0x255   :  { %465 = vmatpush1.bf16.msra.mxu1 %v419_v56  ;;  %v393_v15 = vpop.permute.xlu1 %392 }
 0x256   :  { %v401_v20 = vadd.f32 %v393_v15, %v373_v11  ;;  %v402_v21 = vadd.f32 %v393_v15, %v374_v12  ;;  %v415_v62 = vmax.f32 %v399_v8, %v407_v16  ;;  %v416_v23 = vmax.f32 %v400_v9, %v408_v19 }
 0x258   :  { %v409_v61 = vmul.f32 0.2, %v401_v20  ;;  %v410_v22 = vmul.f32 0.2, %v402_v21 }
 0x25a   :  { %v417_v26 = vmax.f32 %v401_v20, %v409_v61  ;;  %v418_v27 = vmax.f32 %v402_v21, %v410_v22 }
 0x25c   :  { %v421_v29 = vpack.c.bf16 %v417_v26, %v415_v62  ;;  %v422_v32 = vpack.c.bf16 %v418_v27, %v416_v23 }
 0x25e   :  { %466 = vmatprep.subr.bf16.mxu1 %v422_v32 }
 0x25f   :  { %467 = vmatpush1.bf16.msra.mxu1 %v421_v29 }
 0x260   :  { %1345 = vmatprep.subr.bf16.mxu1 %v1471_v6  ;;  %v1374_v6 = vld [vmem:[%s1881_s3 + $0x10] sm:$0xff]   ;;  %s1425_s3 = smov [#allocation2]  }
 0x261   :  { %s992_s11 = sshll.u32 %s1425_s3, 4  ;;  %s993_s11 = int_to_ptr.vmem [resolvable:$true] %s992_s11 }
 0x262   :  { %1013 = vmatmul.mubr.msk.bf16.vlgmr.msra.gmra.mrb[8].mxu1 %vm451_vm1, %v1372_v0  ;;  %s1400_s12 = scalar_lea.vmem %s993_s11, 2048  ;;  %p1405_p1 = scmp.lt.s32.totalorder %s993_s11, %s993_s11 }
 0x263   :  { %506 = vmatprep.mubr.bf16.mxu1 %v1424_v2  ;;  %1353 = vmatpush3.bf16.msra.mxu1 %v1482_v10  ;;  %p1401_p0 = scmp.ne.s32.totalorder %s993_s11, %s1400_s12  ;;  %p1406_p2 = scmp.lt.s32.totalorder %s1400_s12, %s1400_s12 }
 0x264   :  { %1346 = vmatprep.subr.bf16.mxu1 %v1495_v14 }
 0x265   :  { %p1407_p3 = por %p1406_p2, %p1405_p1 }
 0x267   :  { %1354 = vmatpush3.bf16.msra.mxu1 %v1505_v17  ;;  %p1408_p4 = pnand %p1407_p3, %p1401_p0 }
 0x268   :  { %1347 = vmatprep.subr.bf16.mxu1 %v1509_v18 }
 0x26a   :  { %1014 = vmatmul.mubr.msk.bf16.gmra.mrb[12].mxu1 %vm451_vm1, %v1373_v3 }
 0x26b   :  { %516 = vmatprep.mubr.bf16.mxu1 %v1424_v2  ;;  %1355 = vmatpush3.bf16.msra.mxu1 %v1529_v24 }
 0x26c   :  { %1348 = vmatprep.subr.bf16.mxu1 %v1532_v25 }
 0x26f   :  { %1356 = vmatpush3.bf16.msra.mxu1 %v1550_v30 }
 0x270   :  { %1349 = vmatprep.subr.bf16.mxu1 %v1553_v31 }
 0x272   :  { %1015 = vmatmul.mubr.msk.bf16.gmra.mrb[16].mxu1 %vm451_vm1, %v1374_v6 }
 0x273   :  { %526 = vmatprep.mubr.bf16.mxu1 %v1424_v2  ;;  %1357 = vmatpush3.bf16.msra.mxu1 %v1570_v36 }
 0x274   :  { %1350 = vmatprep.subr.bf16.mxu1 %v1573_v37 }
 0x277   :  { %1358 = vmatpush3.bf16.msra.mxu1 %v1590_v42 }
 0x278   :  { %1351 = vmatprep.subr.bf16.mxu1 %v1593_v43 }
 0x27a   :  { %1016 = vmatmul.mubr.msk.bf16.gmra.mrb[20].mxu1 %vm451_vm1, %v1375_v13 }
 0x27b   :  { %1359 = vmatpush3.bf16.msra.mxu1 %v1610_v48 }
 0x27c   :  { %1352 = vmatprep.subr.bf16.mxu1 %v1613_v49 }
 0x27f   :  { %1360 = vmatpush3.bf16.msra.mxu1 %v1627_v52 }
 0x335   :  { %v1732_v2 = vpop.f32.mrb[8].mxu1 }
 0x336   :  { %v1734_v33 = vpop.f32.mrb[9].mxu1 }
 0x337   :  { %v1736_v34 = vpop.f32.mrb[10].mxu1  ;;  %601 = vmatprep.mubr.f32.mxu0 %v1734_v33 }
 0x338   :  { %v1739_v28 = vpop.f32.mrb[11].mxu1  ;;  %602 = vmatmul.mubr.f32.vlgmr.msra.gmra.mrb[16].mxu0 %v1732_v2  ;;  %v644_v38 = vmul.f32 %v1736_v34, %v1736_v34 }
 0x339   :  { %v645_v35 = vmul.f32 %v1739_v28, %v1739_v28  ;;  %1316 = vmatpush3.bf16.msra.mxu0 %v1482_v10  ;;  %606 = vmatprep.mubr.f32.mxu0 %v1739_v28 }
 0x33a   :  { %1318 = vmatprep.subr.bf16.mxu0 %v1495_v14 }
 0x33b   :  { %727 = vmatprep.mubr.f32.mxu1 %v645_v35 }
 0x33c   :  { %607 = vmatmul.mubr.f32.gmra.mrb[18].mxu0 %v1736_v34  ;;  %728 = vmatmul.mubr.f32.vlgmr.msra.gmra.mrb[24].mxu1 %v644_v38 }
 0x33d   :  { %v1750_v39 = vpop.f32.mrb[12].mxu1  ;;  %1320 = vmatpush3.bf16.msra.mxu0 %v1505_v17 }
 0x33e   :  { %v1753_v40 = vpop.f32.mrb[13].mxu1  ;;  %1322 = vmatprep.subr.bf16.mxu0 %v1509_v18  ;;  %v646_v14 = vmul.f32 %v1750_v39, %v1750_v39 }
 0x33f   :  { %v647_v10 = vmul.f32 %v1753_v40, %v1753_v40  ;;  %611 = vmatprep.mubr.f32.mxu0 %v1753_v40  ;;  %v1759_v41 = vpop.f32.mrb[14].mxu1 }
 0x340   :  { %612 = vmatmul.mubr.f32.gmra.mrb[20].mxu0 %v1750_v39  ;;  %v1764_v44 = vpop.f32.mrb[15].mxu1  ;;  %v648_v18 = vmul.f32 %v1759_v41, %v1759_v41 }
 0x341   :  { %1324 = vmatpush3.bf16.msra.mxu0 %v1529_v24  ;;  %732 = vmatprep.mubr.f32.mxu1 %v647_v10  ;;  %v649_v17 = vmul.f32 %v1764_v44, %v1764_v44 }
 0x342   :  { %733 = vmatmul.mubr.f32.gmra.mrb[26].mxu1 %v646_v14  ;;  %616 = vmatprep.mubr.f32.mxu0 %v1764_v44 }
 0x343   :  { %1326 = vmatprep.subr.bf16.mxu0 %v1532_v25  ;;  %737 = vmatprep.mubr.f32.mxu1 %v649_v17 }
 0x344   :  { %617 = vmatmul.mubr.f32.gmra.mrb[22].mxu0 %v1759_v41 }
 0x345   :  { %v1774_v45 = vpop.f32.mrb[16].mxu1  ;;  %1328 = vmatpush3.bf16.msra.mxu0 %v1550_v30 }
 0x346   :  { %v1777_v24 = vpop.f32.mrb[17].mxu1  ;;  %738 = vmatmul.mubr.f32.gmra.mrb[28].mxu1 %v648_v18  ;;  %1330 = vmatprep.subr.bf16.mxu0 %v1553_v31  ;;  %v650_v47 = vmul.f32 %v1774_v45, %v1774_v45 }
 0x347   :  { %v651_v46 = vmul.f32 %v1777_v24, %v1777_v24  ;;  %621 = vmatprep.mubr.f32.mxu0 %v1777_v24  ;;  %v1783_v25 = vpop.f32.mrb[18].mxu1 }
 0x348   :  { %622 = vmatmul.mubr.f32.gmra.mrb[24].mxu0 %v1774_v45  ;;  %v1788_v50 = vpop.f32.mrb[19].mxu1  ;;  %v652_v31 = vmul.f32 %v1783_v25, %v1783_v25 }
 0x349   :  { %1332 = vmatpush3.bf16.msra.mxu0 %v1570_v36  ;;  %742 = vmatprep.mubr.f32.mxu1 %v651_v46  ;;  %v653_v30 = vmul.f32 %v1788_v50, %v1788_v50 }
 0x34a   :  { %743 = vmatmul.mubr.f32.gmra.mrb[30].mxu1 %v650_v47  ;;  %626 = vmatprep.mubr.f32.mxu0 %v1788_v50 }
 0x34b   :  { %1334 = vmatprep.subr.bf16.mxu0 %v1573_v37  ;;  %747 = vmatprep.mubr.f32.mxu1 %v653_v30 }
 0x34c   :  { %627 = vmatmul.mubr.f32.gmra.mrb[26].mxu0 %v1783_v25 }
 0x34d   :  { %v1798_v51 = vpop.f32.mrb[20].mxu1  ;;  %1336 = vmatpush3.bf16.msra.mxu0 %v1590_v42 }
 0x34e   :  { %v1801_v36 = vpop.f32.mrb[21].mxu1  ;;  %748 = vmatmul.mubr.f32.gmra.mrb[32].mxu1 %v652_v31  ;;  %1338 = vmatprep.subr.bf16.mxu0 %v1593_v43  ;;  %v654_v57 = vmul.f32 %v1798_v51, %v1798_v51  ;;  %v643_v43 = vmul.f32 %v1734_v33, %v1734_v33 }
 0x34f   :  { %v655_v55 = vmul.f32 %v1801_v36, %v1801_v36  ;;  %631 = vmatprep.mubr.f32.mxu0 %v1801_v36  ;;  %v1807_v37 = vpop.f32.mrb[22].mxu1 }
 0x350   :  { %632 = vmatmul.mubr.f32.gmra.mrb[28].mxu0 %v1798_v51  ;;  %v1812_v59 = vpop.f32.mrb[23].mxu1  ;;  %v656_v60 = vmul.f32 %v1807_v37, %v1807_v37 }
 0x351   :  { %1340 = vmatpush3.bf16.msra.mxu0 %v1610_v48  ;;  %752 = vmatprep.mubr.f32.mxu1 %v655_v55  ;;  %v657_v42 = vmul.f32 %v1812_v59, %v1812_v59  ;;  %v642_v48 = vmul.f32 %v1732_v2, %v1732_v2 }
 0x352   :  { %753 = vmatmul.mubr.f32.gmra.mrb[34].mxu1 %v654_v57  ;;  %636 = vmatprep.mubr.f32.mxu0 %v1812_v59 }
 0x353   :  { %1342 = vmatprep.subr.bf16.mxu0 %v1613_v49  ;;  %757 = vmatprep.mubr.f32.mxu1 %v657_v42 }
 0x354   :  { %637 = vmatmul.mubr.f32.gmra.mrb[30].mxu0 %v1807_v37 }
 0x355   :  { %1344 = vmatpush3.bf16.msra.mxu0 %v1627_v52  ;;  %722 = vmatprep.mubr.f32.mxu0 %v643_v43 }
 0x356   :  { %758 = vmatmul.mubr.f32.gmra.mrb[36].mxu1 %v656_v60 }
 0x358   :  { %723 = vmatmul.mubr.f32.vlgmr.msra.gmra.mrb[32].mxu0 %v642_v48 }
 0x40b   :  { %v1137_v53 = vpop.f32.mrb[16].mxu0 }
 0x40c   :  { %v1138_v63 = vpop.f32.mrb[17].mxu0 }
 0x40d   :  { %v1827_v54 = vadd.f32 %v1138_v63, %v1137_v53 }
 0x40f   :  { %v1140_v1 = vpop.f32.mrb[18].mxu0  ;;  %v1196_v49 = vpop.f32.mrb[24].mxu1 }
 0x410   :  { %v1141_v4 = vpop.f32.mrb[19].mxu0  ;;  %v1197_v5 = vpop.f32.mrb[25].mxu1 }
 0x411   :  { %v1142_v56 = vadd.f32 %v1141_v4, %v1140_v1  ;;  %v1198_v7 = vadd.f32 %v1197_v5, %v1196_v49 }
 0x413   :  { %v764_v58 = vmul.f32 0.00390625, %v1142_v56  ;;  %v1143_v8 = vpop.f32.mrb[20].mxu0  ;;  %v772_v11 = vmul.f32 0.00390625, %v1198_v7 }
 0x414   :  { %v1144_v9 = vpop.f32.mrb[21].mxu0 }
 0x415   :  { %v780_v52 = vmul.f32 %v764_v58, %v764_v58  ;;  %v1145_v12 = vadd.f32 %v1144_v9, %v1143_v8  ;;  %v1199_v15 = vpop.f32.mrb[26].mxu1  ;;  %v812_v56 = vsub.f32 0.0, %v764_v58 }
 0x416   :  { %v1200_v16 = vpop.f32.mrb[27].mxu1 }
 0x417   :  { %v788_v19 = vsub.f32 %v772_v11, %v780_v52  ;;  %v1829_v20 = vmul.f32 0.00390625, %v1145_v12  ;;  %v1201_v21 = vadd.f32 %v1200_v16, %v1199_v15  ;;  %v1146_v61 = vpop.f32.mrb[22].mxu0 }
 0x418   :  { %v1147_v22 = vpop.f32.mrb[23].mxu0 }
 0x419   :  { %v796_v62 = vadd.f32 1e-05, %v788_v19  ;;  %v781_v23 = vmul.f32 %v1829_v20, %v1829_v20  ;;  %v773_v26 = vmul.f32 0.00390625, %v1201_v21  ;;  %v1202_v27 = vpop.f32.mrb[28].mxu1  ;;  %v1148_v29 = vadd.f32 %v1147_v22, %v1146_v61 }
 0x41a   :  { %v1203_v32 = vpop.f32.mrb[29].mxu1 }
 0x41b   :  { %1384 = vrsqrt.f32 %v796_v62  ;;  %v789_v0 = vsub.f32 %v773_v26, %v781_v23  ;;  %v1204_v3 = vadd.f32 %v1203_v32, %v1202_v27  ;;  %v1149_v6 = vpop.f32.mrb[24].mxu0  ;;  %v1833_v13 = vmul.f32 0.00390625, %v1148_v29 }
 0x41c   :  { %v1150_v35 = vpop.f32.mrb[25].mxu0  ;;  %v813_v62 = vsub.f32 0.0, %v1829_v20 }
 0x41d   :  { %v797_v38 = vadd.f32 1e-05, %v789_v0  ;;  %v774_v10 = vmul.f32 0.00390625, %v1204_v3  ;;  %v1151_v14 = vadd.f32 %v1150_v35, %v1149_v6  ;;  %v1205_v17 = vpop.f32.mrb[30].mxu1  ;;  %v782_v18 = vmul.f32 %v1833_v13, %v1833_v13 }
 0x41e   :  { %v1206_v46 = vpop.f32.mrb[31].mxu1 }
 0x41f   :  { %1386 = vrsqrt.f32 %v797_v38  ;;  %v1837_v47 = vmul.f32 0.00390625, %v1151_v14  ;;  %v1207_v30 = vadd.f32 %v1206_v46, %v1205_v17  ;;  %v1152_v31 = vpop.f32.mrb[26].mxu0  ;;  %v790_v55 = vsub.f32 %v774_v10, %v782_v18 }
 0x420   :  { %v1153_v57 = vpop.f32.mrb[27].mxu0  ;;  %v763_v38 = vmul.f32 0.00390625, %v1827_v54  ;;  %v814_v46 = vsub.f32 0.0, %v1833_v13 }
 0x421   :  { %v783_v42 = vmul.f32 %v1837_v47, %v1837_v47  ;;  %v775_v43 = vmul.f32 0.00390625, %v1207_v30  ;;  %v1154_v60 = vadd.f32 %v1153_v57, %v1152_v31  ;;  %v1208_v48 = vpop.f32.mrb[32].mxu1  ;;  %v798_v53 = vadd.f32 1e-05, %v790_v55 }
 0x422   :  { %v1209_v63 = vpop.f32.mrb[33].mxu1  ;;  %v815_v54 = vsub.f32 0.0, %v1837_v47 }
 0x423   :  { %v791_v1 = vsub.f32 %v775_v43, %v783_v42  ;;  %v1841_v49 = vmul.f32 0.00390625, %v1154_v60  ;;  %v1210_v4 = vadd.f32 %v1209_v63, %v1208_v48  ;;  %v1155_v5 = vpop.f32.mrb[28].mxu0  ;;  %1388 = vrsqrt.f32 %v798_v53 }
 0x424   :  { %v1156_v7 = vpop.f32.mrb[29].mxu0  ;;  %v779_v43 = vmul.f32 %v763_v38, %v763_v38 }
 0x425   :  { %v1385_v8 = vpop.eup %1384  ;;  %v799_v9 = vadd.f32 1e-05, %v791_v1  ;;  %v784_v52 = vmul.f32 %v1841_v49, %v1841_v49  ;;  %v776_v11 = vmul.f32 0.00390625, %v1210_v4  ;;  %v1211_v12 = vpop.f32.mrb[34].mxu1  ;;  %v1157_v15 = vadd.f32 %v1156_v7, %v1155_v5 }
 0x426   :  { %v1212_v16 = vpop.f32.mrb[35].mxu1  ;;  %834 = vperm.xlu1 %1366, %v1385_v8   ;;  %v820_v19 = vmul.f32 %v1385_v8, %v812_v56  ;;  %v816_v56 = vsub.f32 0.0, %v1841_v49 }
 0x427   :  { %1390 = vrsqrt.f32 %v799_v9  ;;  %v792_v21 = vsub.f32 %v776_v11, %v784_v52  ;;  %v1213_v61 = vadd.f32 %v1212_v16, %v1211_v12  ;;  %v1158_v22 = vpop.f32.mrb[30].mxu0  ;;  %v769_v58 = vmul.f32 0.00390625, %v1157_v15 }
 0x428   :  { %v1159_v23 = vpop.f32.mrb[31].mxu0  ;;  %v811_v15 = vsub.f32 0.0, %v763_v38 }
 0x429   :  { %v1387_v26 = vpop.eup %1386  ;;  %v800_v27 = vadd.f32 1e-05, %v792_v21  ;;  %v777_v29 = vmul.f32 0.00390625, %v1213_v61  ;;  %v1160_v32 = vadd.f32 %v1159_v23, %v1158_v22  ;;  %v1214_v0 = vpop.f32.mrb[36].mxu1  ;;  %v785_v3 = vmul.f32 %v769_v58, %v769_v58 }
 0x42a   :  { %839 = vperm.xlu0 %1365, %v1387_v26   ;;  %890 = vperm.xlu1 %1366, %v820_v19   ;;  %v1215_v6 = vpop.f32.mrb[37].mxu1  ;;  %v821_v35 = vmul.f32 %v1387_v26, %v813_v62  ;;  %v817_v9 = vsub.f32 0.0, %v769_v58 }
 0x42b   :  { %1392 = vrsqrt.f32 %v800_v27  ;;  %v770_v10 = vmul.f32 0.00390625, %v1160_v32  ;;  %v1216_v14 = vadd.f32 %v1215_v6, %v1214_v0  ;;  %v1193_v17 = vpop.f32.mrb[32].mxu0  ;;  %v793_v18 = vsub.f32 %v777_v29, %v785_v3 }
 0x42c   :  { %v1194_v20 = vpop.f32.mrb[33].mxu0 }
 0x42d   :  { %v786_v30 = vmul.f32 %v770_v10, %v770_v10  ;;  %v778_v31 = vmul.f32 0.00390625, %v1216_v14  ;;  %v1195_v55 = vadd.f32 %v1194_v20, %v1193_v17  ;;  %v1389_v57 = vpop.eup %1388  ;;  %v801_v42 = vadd.f32 1e-05, %v793_v18 }
 0x42e   :  { %895 = vperm.xlu0 %1365, %v821_v35   ;;  %844 = vperm.xlu1 %1366, %v1389_v57   ;;  %v822_v53 = vmul.f32 %v1389_v57, %v814_v46  ;;  %v818_v11 = vsub.f32 0.0, %v770_v10 }
 0x42f   :  { %v794_v60 = vsub.f32 %v778_v31, %v786_v30  ;;  %v771_v48 = vmul.f32 0.00390625, %v1195_v55  ;;  %1394 = vrsqrt.f32 %v801_v42 }
 0x431   :  { %v1391_v63 = vpop.eup %1390  ;;  %v802_v1 = vadd.f32 1e-05, %v794_v60  ;;  %v787_v4 = vsub.f32 %v771_v48, %v779_v43 }
 0x432   :  { %849 = vperm.xlu0 %1365, %v1391_v63   ;;  %v823_v5 = vmul.f32 %v1391_v63, %v815_v54  ;;  %900 = vperm.xlu1 %1366, %v822_v53  }
 0x433   :  { %1396 = vrsqrt.f32 %v802_v1  ;;  %v795_v13 = vadd.f32 1e-05, %v787_v4 }
 0x435   :  { %v1393_v7 = vpop.eup %1392  ;;  %1398 = vrsqrt.f32 %v795_v13 }
 0x436   :  { %905 = vperm.xlu0 %1365, %v823_v5   ;;  %v824_v8 = vmul.f32 %v1393_v7, %v816_v56  ;;  %854 = vperm.xlu1 %1366, %v1393_v7  }
 0x439   :  { %v1395_v52 = vpop.eup %1394 }
 0x43a   :  { %859 = vperm.xlu0 %1365, %v1395_v52   ;;  %910 = vperm.xlu1 %1366, %v824_v8   ;;  %v825_v47 = vmul.f32 %v1395_v52, %v817_v9 }
 0x43d   :  { %v1397_v12 = vpop.eup %1396 }
 0x43e   :  { %v826_v16 = vmul.f32 %v1397_v12, %v818_v11  ;;  %864 = vperm.xlu1 %1366, %v1397_v12  }
 0x43f   :  { %v1399_v19 = vpop.eup %1398 }
 0x440   :  { %829 = vperm.xlu0 %1365, %v1399_v19   ;;  %v819_v21 = vmul.f32 %v1399_v19, %v811_v15 }
 0x442   :  { %920 = vperm.xlu1 %1366, %v826_v16  }
 0x444   :  { %885 = vperm.xlu0 %1365, %v819_v21  }
 0x448   :  { %915 = vperm.xlu0 %1365, %v825_v47  }
 0x4a5   :  { %v835_v49 = vpop.permute.xlu1 %834 }
 0x4a6   :  { %v869_v61 = vmul.f32 %v835_v49, %v1736_v34  ;;  %v870_v22 = vmul.f32 %v835_v49, %v1739_v28 }
 0x4a9   :  { %v840_v62 = vpop.permute.xlu0 %839  ;;  %v891_v58 = vpop.permute.xlu1 %890 }
 0x4aa   :  { %v925_v23 = vadd.f32 %v891_v58, %v869_v61  ;;  %v926_v26 = vadd.f32 %v891_v58, %v870_v22  ;;  %v871_v27 = vmul.f32 %v840_v62, %v1750_v39  ;;  %v872_v29 = vmul.f32 %v840_v62, %v1753_v40 }
 0x4ac   :  { %v941_v32 = vmul.f32 0.2, %v925_v23  ;;  %v942_v0 = vmul.f32 0.2, %v926_v26 }
 0x4ad   :  { %v896_v3 = vpop.permute.xlu0 %895  ;;  %v845_v14 = vpop.permute.xlu1 %844 }
 0x4ae   :  { %v957_v6 = vmax.f32 %v925_v23, %v941_v32  ;;  %v958_v35 = vmax.f32 %v926_v26, %v942_v0  ;;  %v927_v38 = vadd.f32 %v896_v3, %v871_v27  ;;  %v928_v10 = vadd.f32 %v896_v3, %v872_v29 }
 0x4af   :  { %v873_v17 = vmul.f32 %v845_v14, %v1759_v41  ;;  %v874_v18 = vmul.f32 %v845_v14, %v1764_v44 }
 0x4b0   :  { %973 = vst [vmem:[#allocation2 + $0x10] sm:$0xff] %v957_v6  ;;  %974 = vst [vmem:[#allocation2 + $0x18] sm:$0xff] %v958_v35  ;;  %v943_v34 = vmul.f32 0.2, %v927_v38  ;;  %v944_v28 = vmul.f32 0.2, %v928_v10 }
 0x4b1   :  { %v850_v20 = vpop.permute.xlu0 %849  ;;  %v901_v40 = vpop.permute.xlu1 %900 }
 0x4b2   :  { %v959_v39 = vmax.f32 %v927_v38, %v943_v34  ;;  %v960_v46 = vmax.f32 %v928_v10, %v944_v28  ;;  %v929_v30 = vadd.f32 %v901_v40, %v873_v17  ;;  %v930_v31 = vadd.f32 %v901_v40, %v874_v18 }
 0x4b3   :  { %v875_v55 = vmul.f32 %v850_v20, %v1774_v45  ;;  %v876_v57 = vmul.f32 %v850_v20, %v1777_v24 }
 0x4b4   :  { %975 = vst [vmem:[#allocation2 + $0x20] sm:$0xff] %v959_v39  ;;  %976 = vst [vmem:[#allocation2 + $0x28] sm:$0xff] %v960_v46  ;;  %v945_v42 = vmul.f32 0.2, %v929_v30  ;;  %v946_v43 = vmul.f32 0.2, %v930_v31 }
 0x4b5   :  { %v906_v60 = vpop.permute.xlu0 %905  ;;  %v855_v41 = vpop.permute.xlu1 %854 }
 0x4b6   :  { %v931_v48 = vadd.f32 %v906_v60, %v875_v55  ;;  %v932_v53 = vadd.f32 %v906_v60, %v876_v57  ;;  %v961_v54 = vmax.f32 %v929_v30, %v945_v42  ;;  %v962_v44 = vmax.f32 %v930_v31, %v946_v43 }
 0x4b7   :  { %v877_v4 = vmul.f32 %v855_v41, %v1783_v25  ;;  %v878_v5 = vmul.f32 %v855_v41, %v1788_v50 }
 0x4b8   :  { %v947_v63 = vmul.f32 0.2, %v931_v48  ;;  %v948_v1 = vmul.f32 0.2, %v932_v53  ;;  %977 = vst [vmem:[#allocation2 + $0x30] sm:$0xff] %v961_v54  ;;  %978 = vst [vmem:[#allocation2 + $0x38] sm:$0xff] %v962_v44 }
 0x4b9   :  { %v911_v56 = vpop.permute.xlu1 %910  ;;  %v860_v24 = vpop.permute.xlu0 %859 }
 0x4ba   :  { %v963_v13 = vmax.f32 %v931_v48, %v947_v63  ;;  %v964_v45 = vmax.f32 %v932_v53, %v948_v1  ;;  %v933_v7 = vadd.f32 %v911_v56, %v877_v4  ;;  %v934_v8 = vadd.f32 %v911_v56, %v878_v5 }
 0x4bb   :  { %v879_v27 = vmul.f32 %v860_v24, %v1798_v51  ;;  %v880_v29 = vmul.f32 %v860_v24, %v1801_v36 }
 0x4bc   :  { %979 = vst [vmem:[#allocation2 + $0x40] sm:$0xff] %v963_v13  ;;  %980 = vst [vmem:[#allocation2 + $0x48] sm:$0xff] %v964_v45  ;;  %v949_v9 = vmul.f32 0.2, %v933_v7  ;;  %v950_v52 = vmul.f32 0.2, %v934_v8 }
 0x4bd   :  { %v865_v47 = vpop.permute.xlu1 %864 }
 0x4be   :  { %v965_v11 = vmax.f32 %v933_v7, %v949_v9  ;;  %v966_v12 = vmax.f32 %v934_v8, %v950_v52  ;;  %v881_v25 = vmul.f32 %v865_v47, %v1807_v37  ;;  %v882_v50 = vmul.f32 %v865_v47, %v1812_v59 }
 0x4bf   :  { %v830_v15 = vpop.permute.xlu0 %829 }
 0x4c0   :  { %981 = vst [vmem:[#allocation2 + $0x50] sm:$0xff] %v965_v11  ;;  %982 = vst [vmem:[#allocation2 + $0x58] sm:$0xff] %v966_v12  ;;  %v867_v16 = vmul.f32 %v830_v15, %v1732_v2  ;;  %v868_v19 = vmul.f32 %v830_v15, %v1734_v33 }
 0x4c1   :  { %v921_v21 = vpop.permute.xlu1 %920 }
 0x4c2   :  { %v937_v49 = vadd.f32 %v921_v21, %v881_v25  ;;  %v938_v61 = vadd.f32 %v921_v21, %v882_v50 }
 0x4c3   :  { %v886_v22 = vpop.permute.xlu0 %885 }
 0x4c4   :  { %v923_v62 = vadd.f32 %v886_v22, %v867_v16  ;;  %v924_v58 = vadd.f32 %v886_v22, %v868_v19  ;;  %v953_v23 = vmul.f32 0.2, %v937_v49  ;;  %v954_v26 = vmul.f32 0.2, %v938_v61 }
 0x4c6   :  { %v939_v32 = vmul.f32 0.2, %v923_v62  ;;  %v940_v37 = vmul.f32 0.2, %v924_v58  ;;  %v969_v0 = vmax.f32 %v937_v49, %v953_v23  ;;  %v970_v59 = vmax.f32 %v938_v61, %v954_v26 }
 0x4c7   :  { %v916_v3 = vpop.permute.xlu0 %915 }
 0x4c8   :  { %v955_v2 = vmax.f32 %v923_v62, %v939_v32  ;;  %v956_v6 = vmax.f32 %v924_v58, %v940_v37  ;;  %v935_v33 = vadd.f32 %v916_v3, %v879_v27  ;;  %v936_v35 = vadd.f32 %v916_v3, %v880_v29  ;;  %985 = vst [vmem:[#allocation2 + $0x70] sm:$0xff] %v969_v0 }
 0x4c9   :  { %986 = vst [vmem:[#allocation2 + $0x78] sm:$0xff] %v970_v59 }
 0x4ca   :  { %971 = vst [vmem:[#allocation2] sm:$0xff] %v955_v2  ;;  %972 = vst [vmem:[#allocation2 + $0x8] sm:$0xff] %v956_v6  ;;  %v951_v38 = vmul.f32 0.2, %v935_v33  ;;  %v952_v10 = vmul.f32 0.2, %v936_v35 }
 0x4cc   :  { %v967_v51 = vmax.f32 %v935_v33, %v951_v38  ;;  %v968_v14 = vmax.f32 %v936_v35, %v952_v10 }
 0x4ce   :  { %983 = vst [vmem:[#allocation2 + $0x60] sm:$0xff] %v967_v51  ;;  %984 = vst [vmem:[#allocation2 + $0x68] sm:$0xff] %v968_v14 }
 0x4cf   :  { %1411 = shalt.err (!%p1408_p4)
}
 0x4d0   :  { %s1412_s15 = scalar_lea.hbm %s1882_s4, 2048 }
 0x4d1   :  { %p1413_p5 = scmp.ne.s32.totalorder %s1882_s4, %s1412_s15  ;;  %p1416_p6 = scmp.lt.u32.totalorder %s1412_s15, %s1882_s4 }
 0x4d3   :  { %p1418_p7 = pnand %p1416_p6, %p1413_p5 }
 0x4d5   :  { %1421 = shalt.err (!%p1418_p7)
}
 0x4d6   :  { %s1426_s20 = smov 256   ;;  %s1427_s21 = smov 16  }
 0x4d7   :  { %998 = dma.vmem_to_hbm [thread:$0]  %s993_s11, 2048, %s1882_s4, [#allocation3], %s1426_s20, %s1426_s20, %s1427_s21  }
 0x4d8   :  { %1422 = dma.done.wait [#allocation3], 2048  }
 0x4d9   :  { %1423 = vsyncadd [#allocation3], 4294965248 }
 0x4da   :  { %1002 = vsyncpa [#allocation3], 1 }

</bundles_post_ra>
